<compile_context>
chip_gen: v7x
topology: tpu7x:2x2x1
jax: 0.10.0
libtpu: 0.0.40
codegen_flags: <defaults>
</compile_context>

<pallas_src>
import functools

import jax
import jax.numpy as jnp
from jax.experimental import pallas as pl
from jax.experimental.pallas import tpu as pltpu


def _dqn_mlp(x_ref, p32_ref, p16_ref):
    """Shared MLP body: returns lane-dense (blk, 128) f32 Q tile."""
    x = x_ref[...]                                          # (BLK, 4) f32

    # ---- fc1 (4 -> 256) on the VPU: tree-structured broadcast-FMA (depth 3).
    # An MXU matmul with K=4 would use <4% of the array and add a push/pop. ----
    t01 = x[:, 0:1] * p32_ref[0:1, :] + x[:, 1:2] * p32_ref[1:2, :]
    t23 = x[:, 2:3] * p32_ref[2:3, :] + x[:, 3:4] * p32_ref[3:4, :]
    h1 = jnp.maximum((t01 + t23) + p32_ref[4:5, :], 0.0)    # (BLK, 256) f32

    # ---- fc2 (256 -> 64, output zero-padded to 128 lanes) on the MXU,
    # bf16 operands, f32 accumulate; bias add + ReLU in f32. ----
    h2 = jnp.dot(h1.astype(jnp.bfloat16), p16_ref[0:256, :],
                 preferred_element_type=jnp.float32)        # (BLK, 128)
    h2 = jnp.maximum(h2 + p32_ref[5:6, 0:128], 0.0)

    # ---- fc3 (64 -> 8) on the MXU; full 128-lane weight slice (cols 8..127
    # zero) so h3 is an unmasked (BLK, 128) tile -- same MXU cost as N=8. ----
    h3 = jnp.dot(h2.astype(jnp.bfloat16), p16_ref[256:384, :],
                 preferred_element_type=jnp.float32)        # (BLK, 128)
    h3 = jnp.maximum(h3 + p32_ref[6:7, 0:128], 0.0)         # lanes 8..127 stay 0

    # ---- fc4 (8 -> n_actions, lane-dense 128-wide output) on the VPU,
    # pairwise-summed (serial depth 4 instead of 9). ----
    # TODO(synk): benchmark MXU fc4 on v7x (MRB) vs this VPU tail.
    t = [h3[:, k:k + 1] * p32_ref[8 + k:9 + k, 0:128] for k in range(8)]
    s0 = (t[0] + t[1]) + (t[2] + t[3])
    s1 = (t[4] + t[5]) + (t[6] + t[7])
    return (s0 + s1) + p32_ref[7:8, 0:128]                  # (BLK, 128) f32


def dqn_q_kernel(x_ref, p32_ref, p16_ref, o_ref):
    o_ref[...] = _dqn_mlp(x_ref, p32_ref, p16_ref).astype(o_ref.dtype)


def dqn_act_kernel(n_actions, x_ref, p32_ref, p16_ref, a_ref):
    """Fused greedy action: argmax over the valid action lanes, in-kernel."""
    q = _dqn_mlp(x_ref, p32_ref, p16_ref)                   # (BLK, 128) f32
    lane = jax.lax.broadcasted_iota(jnp.int32, q.shape, dimension=1)
    qm = jnp.where(lane < n_actions, q, -jnp.inf)
    mx = jnp.max(qm, axis=-1, keepdims=True)
    # First index attaining the max (matches torch .max(1)[1] tie behavior).
    a_ref[...] = jnp.min(jnp.where(qm == mx, lane, q.shape[-1]),
                         axis=-1, keepdims=True)


def pack_params(params, n_actions):
    """Pack the 4 (w, b) pairs into one f32 slab and one bf16 slab."""
    assert n_actions <= 128
    w1, b1 = params["fc1"]
    w2, b2 = params["fc2"]
    w3, b3 = params["fc3"]
    w4, b4 = params["fc4"]

    p32 = jnp.zeros((16, 256), jnp.float32)
    p32 = p32.at[0:4, :].set(w1)
    p32 = p32.at[4, :].set(b1[0])
    p32 = p32.at[5, 0:64].set(b2[0])
    p32 = p32.at[6, 0:8].set(b3[0])
    p32 = p32.at[7, 0:n_actions].set(b4[0])
    p32 = p32.at[8:16, 0:n_actions].set(w4)

    p16 = jnp.zeros((384, 128), jnp.bfloat16)
    p16 = p16.at[0:256, 0:64].set(w2.astype(jnp.bfloat16))
    p16 = p16.at[256:320, 0:8].set(w3.astype(jnp.bfloat16))
    return p32, p16


def _round_up(n, m):
    return (n + m - 1) // m * m


def _cdiv(a, b):
    return -(-a // b)


def _grid_params(batch):
    """Choose (block_rows, padded_rows).

    - batch <= 128: single grid step, block rounded to 16 rows (whole packed
      bf16 vreg for the MXU LHS).
    - batch  > 128: an EVEN number of grid steps (balanced across v7x's two
      TensorCores), each block <= 512 rows, rounded to 16.  VMEM footprint at
      blk=512 is < 2 MiB, far under every generation's scoped-VMEM default.
    """
    if batch <= 128:
        blk = _round_up(max(batch, 1), 16)
        return blk, blk
    n_blocks = 2 * _cdiv(batch, 2 * 512)          # even, each block <= 512 rows
    blk = _round_up(_cdiv(batch, n_blocks), 16)
    return blk, n_blocks * blk


def _run_dqn_kernel(kernel, x, p32, p16, out_dtype, out_lanes):
    batch, obs = x.shape
    assert obs == 4, "CartPole DQN branch expects obs_dim == 4"
    blk, padded = _grid_params(batch)
    if padded != batch:
        x = jnp.pad(x, ((0, padded - batch), (0, 0)))

    return pl.pallas_call(
        kernel,
        out_shape=jax.ShapeDtypeStruct((padded, out_lanes), out_dtype),
        grid_spec=pltpu.PrefetchScalarGridSpec(
            num_scalar_prefetch=0,
            grid=(padded // blk,),
            in_specs=[
                pl.BlockSpec((blk, obs), lambda i: (i, 0)),
                pl.BlockSpec(p32.shape, lambda i: (0, 0)),
                pl.BlockSpec(p16.shape, lambda i: (0, 0)),
            ],
            out_specs=pl.BlockSpec((blk, out_lanes), lambda i: (i, 0)),
        ),
        compiler_params=pltpu.CompilerParams(
            dimension_semantics=("parallel",)),
    )(x, p32, p16)


@functools.partial(jax.jit, static_argnames=("n_actions",))
def dqn_forward(x, p32, p16, *, n_actions):
    """x: [B, 4] float32 -> Q-values [B, n_actions] float32."""
    batch = x.shape[0]
    out = _run_dqn_kernel(dqn_q_kernel, x, p32, p16, jnp.float32, 128)
    return out[:batch, :n_actions]


@functools.partial(jax.jit, static_argnames=("n_actions",))
def dqn_act(x, p32, p16, *, n_actions):
    """Fused greedy-action path: x: [B, 4] -> int32 [B, 1] action indices."""
    batch = x.shape[0]
    kernel = functools.partial(dqn_act_kernel, n_actions)
    act = _run_dqn_kernel(kernel, x, p32, p16, jnp.int32, 1)
    # TODO(synk): the epsilon-random exploration branch of act() is host-side
    # python RNG in the reference and stays outside the kernel.
    return act[:batch]


def init_linear(key, fan_in, fan_out):
    """Mimics PyTorch's default U(-1/sqrt(in), 1/sqrt(in)) init.

    Weight is returned in (in, out) layout (pre-transposed for `x @ W`);
    bias is a (1, out) row.
    """
    kw, kb = jax.random.split(key)
    bound = 1.0 / jnp.sqrt(jnp.float32(fan_in))
    w = jax.random.uniform(kw, (fan_in, fan_out), jnp.float32, -bound, bound)
    b = jax.random.uniform(kb, (1, fan_out), jnp.float32, -bound, bound)
    return w, b


if __name__ == "__main__":
    env_config = {
        "batch_size": 32, "gamma": 0.95, "eps_start": 1.0, "eps_end": 0.05,
        "anneal_length": 10 ** 4, "n_actions": 2, "obs_stack_size": 1,
    }
    n_actions = env_config["n_actions"]

    key = jax.random.PRNGKey(0)
    k1, k2, k3, k4, kx1, kx2 = jax.random.split(key, 6)
    params = {
        "fc1": init_linear(k1, 4, 256),
        "fc2": init_linear(k2, 256, 64),
        "fc3": init_linear(k3, 64, 8),
        "fc4": init_linear(k4, 8, n_actions),
    }
    p32, p16 = pack_params(params, n_actions)

    def ref_forward(x, params):
        """Plain-JAX reference mirroring the kernel's bf16-operand matmuls."""
        w1, b1 = params["fc1"]
        w2, b2 = params["fc2"]
        w3, b3 = params["fc3"]
        w4, b4 = params["fc4"]
        h = jnp.maximum(x @ w1 + b1, 0.0)
        h = jnp.maximum(
            jnp.dot(h.astype(jnp.bfloat16), w2.astype(jnp.bfloat16),
                    preferred_element_type=jnp.float32) + b2, 0.0)
        h = jnp.maximum(
            jnp.dot(h.astype(jnp.bfloat16), w3.astype(jnp.bfloat16),
                    preferred_element_type=jnp.float32) + b3, 0.0)
        return h @ w4 + b4

    # Tiny act()-style batch: [batch=2, obs_dim=4].
    x_small = jax.random.normal(kx1, (2, 4), jnp.float32)
    out_small = jax.block_until_ready(
        dqn_forward(x_small, p32, p16, n_actions=n_actions))
    assert out_small.shape == (2, n_actions) and out_small.dtype == jnp.float32
    assert jnp.allclose(out_small, ref_forward(x_small, params),
                        atol=1e-2, rtol=1e-2)

    # Fused greedy-action kernel: must agree with argmax of the Q kernel.
    act_small = jax.block_until_ready(
        dqn_act(x_small, p32, p16, n_actions=n_actions))
    assert act_small.shape == (2, 1) and act_small.dtype == jnp.int32
    assert jnp.array_equal(act_small[:, 0],
                           jnp.argmax(out_small, axis=1).astype(jnp.int32))

    # Replay-buffer-style batch exercising the even 2-way parallel grid
    # (blk=160, padded=320, grid=2) + padding/slice-back.
    x_big = jax.random.normal(kx2, (300, 4), jnp.float32)
    out_big = jax.block_until_ready(
        dqn_forward(x_big, p32, p16, n_actions=n_actions))
    assert out_big.shape == (300, n_actions)
    assert jnp.allclose(out_big, ref_forward(x_big, params),
                        atol=1e-2, rtol=1e-2)

    # TODO(synk): Pong conv branch (Conv2d x3 + FC) not implemented; this
    # script covers the CartPole MLP branch of DQN.forward.
    print("KERNEL_OK")
</pallas_src>

<mosaic_0001>
module attributes {stable_mosaic.version = 11 : i64} {
  func.func @dqn_q_kernel(%arg0: i32, %arg1: memref<16x4xf32, #tpu.memory_space<vmem>>, %arg2: memref<16x256xf32, #tpu.memory_space<vmem>>, %arg3: memref<384x128xbf16, #tpu.memory_space<vmem>>, %arg4: memref<16x128xf32, #tpu.memory_space<vmem>>) attributes {dimension_semantics = [#tpu.dimension_semantics<parallel>], iteration_bounds = array<i64: 1>, scalar_prefetch = 0 : i64, scratch_operands = 0 : i64, tpu.core_type = #tpu.core_type<tc>, window_params = [{transform_indices = @transform_0, window_bounds = array<i64: 16, 4>}, {pipeline_mode = #tpu.pipeline_mode<synchronous>, transform_indices = @transform_1, window_bounds = array<i64: 16, 256>}, {pipeline_mode = #tpu.pipeline_mode<synchronous>, transform_indices = @transform_2, window_bounds = array<i64: 384, 128>}, {transform_indices = @transform_3, window_bounds = array<i64: 16, 128>}]} {
    %c0 = arith.constant 0 : index
    %c0_0 = arith.constant 0 : index
    %0 = vector.load %arg1[%c0, %c0_0] : memref<16x4xf32, #tpu.memory_space<vmem>>, vector<16x4xf32>
    %1 = vector.extract_strided_slice %0 {offsets = [0, 0], sizes = [16, 1], strides = [1, 1]} : vector<16x4xf32> to vector<16x1xf32>
    %c0_1 = arith.constant 0 : index
    %c0_2 = arith.constant 0 : index
    %2 = vector.load %arg2[%c0_1, %c0_2] : memref<16x256xf32, #tpu.memory_space<vmem>>, vector<1x256xf32>
    %3 = vector.broadcast %1 : vector<16x1xf32> to vector<16x256xf32>
    %4 = vector.broadcast %2 : vector<1x256xf32> to vector<16x256xf32>
    %5 = arith.mulf %3, %4 : vector<16x256xf32>
    %6 = vector.extract_strided_slice %0 {offsets = [0, 1], sizes = [16, 1], strides = [1, 1]} : vector<16x4xf32> to vector<16x1xf32>
    %c1 = arith.constant 1 : index
    %c0_3 = arith.constant 0 : index
    %7 = vector.load %arg2[%c1, %c0_3] : memref<16x256xf32, #tpu.memory_space<vmem>>, vector<1x256xf32>
    %8 = vector.broadcast %6 : vector<16x1xf32> to vector<16x256xf32>
    %9 = vector.broadcast %7 : vector<1x256xf32> to vector<16x256xf32>
    %10 = arith.mulf %8, %9 : vector<16x256xf32>
    %11 = arith.addf %5, %10 : vector<16x256xf32>
    %12 = vector.extract_strided_slice %0 {offsets = [0, 2], sizes = [16, 1], strides = [1, 1]} : vector<16x4xf32> to vector<16x1xf32>
    %c2 = arith.constant 2 : index
    %c0_4 = arith.constant 0 : index
    %13 = vector.load %arg2[%c2, %c0_4] : memref<16x256xf32, #tpu.memory_space<vmem>>, vector<1x256xf32>
    %14 = vector.broadcast %12 : vector<16x1xf32> to vector<16x256xf32>
    %15 = vector.broadcast %13 : vector<1x256xf32> to vector<16x256xf32>
    %16 = arith.mulf %14, %15 : vector<16x256xf32>
    %17 = vector.extract_strided_slice %0 {offsets = [0, 3], sizes = [16, 1], strides = [1, 1]} : vector<16x4xf32> to vector<16x1xf32>
    %c3 = arith.constant 3 : index
    %c0_5 = arith.constant 0 : index
    %18 = vector.load %arg2[%c3, %c0_5] : memref<16x256xf32, #tpu.memory_space<vmem>>, vector<1x256xf32>
    %19 = vector.broadcast %17 : vector<16x1xf32> to vector<16x256xf32>
    %20 = vector.broadcast %18 : vector<1x256xf32> to vector<16x256xf32>
    %21 = arith.mulf %19, %20 : vector<16x256xf32>
    %22 = arith.addf %16, %21 : vector<16x256xf32>
    %23 = arith.addf %11, %22 : vector<16x256xf32>
    %c4 = arith.constant 4 : index
    %c0_6 = arith.constant 0 : index
    %24 = vector.load %arg2[%c4, %c0_6] : memref<16x256xf32, #tpu.memory_space<vmem>>, vector<1x256xf32>
    %25 = vector.broadcast %24 : vector<1x256xf32> to vector<16x256xf32>
    %26 = arith.addf %23, %25 : vector<16x256xf32>
    %cst = arith.constant 0.000000e+00 : f32
    %27 = vector.broadcast %cst : f32 to vector<16x256xf32>
    %28 = arith.maximumf %26, %27 : vector<16x256xf32>
    %29 = arith.truncf %28 : vector<16x256xf32> to vector<16x256xbf16>
    %c0_7 = arith.constant 0 : index
    %c0_8 = arith.constant 0 : index
    %30 = vector.load %arg3[%c0_7, %c0_8] : memref<384x128xbf16, #tpu.memory_space<vmem>>, vector<256x128xbf16>
    %cst_9 = arith.constant dense<0.000000e+00> : vector<16x128xf32>
    %31 = tpu.matmul %29, %30, %cst_9 {dimension_numbers = #tpu.dot_dimension_numbers<[1], [0], [0], [1], [0, 0, 1, 1], [], []>} : vector<16x256xbf16>, vector<256x128xbf16>, vector<16x128xf32> -> vector<16x128xf32>
    %c5 = arith.constant 5 : index
    %c0_10 = arith.constant 0 : index
    %32 = vector.load %arg2[%c5, %c0_10] : memref<16x256xf32, #tpu.memory_space<vmem>>, vector<1x128xf32>
    %33 = vector.broadcast %32 : vector<1x128xf32> to vector<16x128xf32>
    %34 = arith.addf %31, %33 : vector<16x128xf32>
    %cst_11 = arith.constant 0.000000e+00 : f32
    %35 = vector.broadcast %cst_11 : f32 to vector<16x128xf32>
    %36 = arith.maximumf %34, %35 : vector<16x128xf32>
    %37 = arith.truncf %36 : vector<16x128xf32> to vector<16x128xbf16>
    %c256 = arith.constant 256 : index
    %c0_12 = arith.constant 0 : index
    %38 = vector.load %arg3[%c256, %c0_12] : memref<384x128xbf16, #tpu.memory_space<vmem>>, vector<128x128xbf16>
    %cst_13 = arith.constant dense<0.000000e+00> : vector<16x128xf32>
    %39 = tpu.matmul %37, %38, %cst_13 {dimension_numbers = #tpu.dot_dimension_numbers<[1], [0], [0], [1], [0, 0, 1, 1], [], []>} : vector<16x128xbf16>, vector<128x128xbf16>, vector<16x128xf32> -> vector<16x128xf32>
    %c6 = arith.constant 6 : index
    %c0_14 = arith.constant 0 : index
    %40 = vector.load %arg2[%c6, %c0_14] : memref<16x256xf32, #tpu.memory_space<vmem>>, vector<1x128xf32>
    %41 = vector.broadcast %40 : vector<1x128xf32> to vector<16x128xf32>
    %42 = arith.addf %39, %41 : vector<16x128xf32>
    %cst_15 = arith.constant 0.000000e+00 : f32
    %43 = vector.broadcast %cst_15 : f32 to vector<16x128xf32>
    %44 = arith.maximumf %42, %43 : vector<16x128xf32>
    %45 = vector.extract_strided_slice %44 {offsets = [0, 0], sizes = [16, 1], strides = [1, 1]} : vector<16x128xf32> to vector<16x1xf32>
    %c8 = arith.constant 8 : index
    %c0_16 = arith.constant 0 : index
    %46 = vector.load %arg2[%c8, %c0_16] : memref<16x256xf32, #tpu.memory_space<vmem>>, vector<1x128xf32>
    %47 = vector.broadcast %45 : vector<16x1xf32> to vector<16x128xf32>
    %48 = vector.broadcast %46 : vector<1x128xf32> to vector<16x128xf32>
    %49 = arith.mulf %47, %48 : vector<16x128xf32>
    %50 = vector.extract_strided_slice %44 {offsets = [0, 1], sizes = [16, 1], strides = [1, 1]} : vector<16x128xf32> to vector<16x1xf32>
    %c9 = arith.constant 9 : index
    %c0_17 = arith.constant 0 : index
    %51 = vector.load %arg2[%c9, %c0_17] : memref<16x256xf32, #tpu.memory_space<vmem>>, vector<1x128xf32>
    %52 = vector.broadcast %50 : vector<16x1xf32> to vector<16x128xf32>
    %53 = vector.broadcast %51 : vector<1x128xf32> to vector<16x128xf32>
    %54 = arith.mulf %52, %53 : vector<16x128xf32>
    %55 = vector.extract_strided_slice %44 {offsets = [0, 2], sizes = [16, 1], strides = [1, 1]} : vector<16x128xf32> to vector<16x1xf32>
    %c10 = arith.constant 10 : index
    %c0_18 = arith.constant 0 : index
    %56 = vector.load %arg2[%c10, %c0_18] : memref<16x256xf32, #tpu.memory_space<vmem>>, vector<1x128xf32>
    %57 = vector.broadcast %55 : vector<16x1xf32> to vector<16x128xf32>
    %58 = vector.broadcast %56 : vector<1x128xf32> to vector<16x128xf32>
    %59 = arith.mulf %57, %58 : vector<16x128xf32>
    %60 = vector.extract_strided_slice %44 {offsets = [0, 3], sizes = [16, 1], strides = [1, 1]} : vector<16x128xf32> to vector<16x1xf32>
    %c11 = arith.constant 11 : index
    %c0_19 = arith.constant 0 : index
    %61 = vector.load %arg2[%c11, %c0_19] : memref<16x256xf32, #tpu.memory_space<vmem>>, vector<1x128xf32>
    %62 = vector.broadcast %60 : vector<16x1xf32> to vector<16x128xf32>
    %63 = vector.broadcast %61 : vector<1x128xf32> to vector<16x128xf32>
    %64 = arith.mulf %62, %63 : vector<16x128xf32>
    %65 = vector.extract_strided_slice %44 {offsets = [0, 4], sizes = [16, 1], strides = [1, 1]} : vector<16x128xf32> to vector<16x1xf32>
    %c12 = arith.constant 12 : index
    %c0_20 = arith.constant 0 : index
    %66 = vector.load %arg2[%c12, %c0_20] : memref<16x256xf32, #tpu.memory_space<vmem>>, vector<1x128xf32>
    %67 = vector.broadcast %65 : vector<16x1xf32> to vector<16x128xf32>
    %68 = vector.broadcast %66 : vector<1x128xf32> to vector<16x128xf32>
    %69 = arith.mulf %67, %68 : vector<16x128xf32>
    %70 = vector.extract_strided_slice %44 {offsets = [0, 5], sizes = [16, 1], strides = [1, 1]} : vector<16x128xf32> to vector<16x1xf32>
    %c13 = arith.constant 13 : index
    %c0_21 = arith.constant 0 : index
    %71 = vector.load %arg2[%c13, %c0_21] : memref<16x256xf32, #tpu.memory_space<vmem>>, vector<1x128xf32>
    %72 = vector.broadcast %70 : vector<16x1xf32> to vector<16x128xf32>
    %73 = vector.broadcast %71 : vector<1x128xf32> to vector<16x128xf32>
    %74 = arith.mulf %72, %73 : vector<16x128xf32>
    %75 = vector.extract_strided_slice %44 {offsets = [0, 6], sizes = [16, 1], strides = [1, 1]} : vector<16x128xf32> to vector<16x1xf32>
    %c14 = arith.constant 14 : index
    %c0_22 = arith.constant 0 : index
    %76 = vector.load %arg2[%c14, %c0_22] : memref<16x256xf32, #tpu.memory_space<vmem>>, vector<1x128xf32>
    %77 = vector.broadcast %75 : vector<16x1xf32> to vector<16x128xf32>
    %78 = vector.broadcast %76 : vector<1x128xf32> to vector<16x128xf32>
    %79 = arith.mulf %77, %78 : vector<16x128xf32>
    %80 = vector.extract_strided_slice %44 {offsets = [0, 7], sizes = [16, 1], strides = [1, 1]} : vector<16x128xf32> to vector<16x1xf32>
    %c15 = arith.constant 15 : index
    %c0_23 = arith.constant 0 : index
    %81 = vector.load %arg2[%c15, %c0_23] : memref<16x256xf32, #tpu.memory_space<vmem>>, vector<1x128xf32>
    %82 = vector.broadcast %80 : vector<16x1xf32> to vector<16x128xf32>
    %83 = vector.broadcast %81 : vector<1x128xf32> to vector<16x128xf32>
    %84 = arith.mulf %82, %83 : vector<16x128xf32>
    %85 = arith.addf %49, %54 : vector<16x128xf32>
    %86 = arith.addf %59, %64 : vector<16x128xf32>
    %87 = arith.addf %85, %86 : vector<16x128xf32>
    %88 = arith.addf %69, %74 : vector<16x128xf32>
    %89 = arith.addf %79, %84 : vector<16x128xf32>
    %90 = arith.addf %88, %89 : vector<16x128xf32>
    %91 = arith.addf %87, %90 : vector<16x128xf32>
    %c7 = arith.constant 7 : index
    %c0_24 = arith.constant 0 : index
    %92 = vector.load %arg2[%c7, %c0_24] : memref<16x256xf32, #tpu.memory_space<vmem>>, vector<1x128xf32>
    %93 = vector.broadcast %92 : vector<1x128xf32> to vector<16x128xf32>
    %94 = arith.addf %91, %93 : vector<16x128xf32>
    %c0_25 = arith.constant 0 : index
    %c0_26 = arith.constant 0 : index
    %95 = vector.load %arg4[%c0_25, %c0_26] : memref<16x128xf32, #tpu.memory_space<vmem>>, vector<16x128xf32>
    tpu.vector_store %arg4[%c0_25, %c0_26], %94 {strides = array<i32>} : memref<16x128xf32, #tpu.memory_space<vmem>>, vector<16x128xf32>,
    return
  }
  func.func @transform_0(%arg0: i32) -> (i32, i32) {
    %c0_i32 = arith.constant 0 : i32
    %c0_i32_0 = arith.constant 0 : i32
    return %arg0, %c0_i32 : i32, i32
  }
  func.func @transform_1(%arg0: i32) -> (i32, i32) {
    %c0_i32 = arith.constant 0 : i32
    %c0_i32_0 = arith.constant 0 : i32
    %c0_i32_1 = arith.constant 0 : i32
    return %c0_i32, %c0_i32_0 : i32, i32
  }
  func.func @transform_2(%arg0: i32) -> (i32, i32) {
    %c0_i32 = arith.constant 0 : i32
    %c0_i32_0 = arith.constant 0 : i32
    %c0_i32_1 = arith.constant 0 : i32
    return %c0_i32, %c0_i32_0 : i32, i32
  }
  func.func @transform_3(%arg0: i32) -> (i32, i32) {
    %c0_i32 = arith.constant 0 : i32
    %c0_i32_0 = arith.constant 0 : i32
    return %arg0, %c0_i32 : i32, i32
  }
}

</mosaic_0001>

<bundles_post_ra>
// kernel: dqn_forward.1
= control target key start
LH: loop header
LB: loop body
LE: loop exit
PB: predicated region body
PF: predicated region fallthrough
CT: control target
= control target key end

     0   :  { %8 = vsyncpa [#allocation3], 0  ;;  %s857_s0 = inlined_call_operand.vmem [shape: f32[16,4], index: 0, kind: input, shape index: {}]   ;;  %s858_s1 = inlined_call_operand.hbm [shape: f32[16,256], index: 1, kind: input, shape index: {}]   ;;  %s859_s2 = inlined_call_operand.hbm [shape: bf16[384,128], index: 2, kind: input, shape index: {}]   ;;  %s860_s3 = inlined_call_operand.vmem [shape: f32[16,128], index: 3, kind: output, shape index: {}]  }
   0x1   :  { %9 = vsyncpa [#allocation5], 0  ;;  %s762_s12 = smov [#allocation2]   ;;  %s714_s16 = scalar_lea.hbm %s858_s1, 512 }
   0x2   :  { %s17_s13 = sshll.u32 %s762_s12, 4  ;;  %p715_p0 = scmp.ne.s32.totalorder %s858_s1, %s714_s16  ;;  %s18_s13 = int_to_ptr.vmem [resolvable:$true] %s17_s13 }
   0x3   :  { %p718_p1 = scmp.lt.u32.totalorder %s714_s16, %s858_s1 }
   0x5   :  { %p720_p2 = pnand %p718_p1, %p715_p0 }
   0x7   :  { %723 = shalt.err (!%p720_p2)
}
   0x8   :  { %s724_s21 = scalar_lea.vmem %s18_s13, 512  ;;  %p729_p4 = scmp.lt.s32.totalorder %s18_s13, %s18_s13 }
   0x9   :  { %p725_p3 = scmp.ne.s32.totalorder %s18_s13, %s724_s21  ;;  %p730_p5 = scmp.lt.s32.totalorder %s724_s21, %s724_s21 }
   0xb   :  { %p731_p6 = por %p730_p5, %p729_p4 }
   0xd   :  { %p732_p7 = pnand %p731_p6, %p725_p3 }
   0xf   :  { %735 = shalt.err (!%p732_p7)
}
  0x10   :  { %s763_s22 = smov 256   ;;  %s764_s23 = smov 16  }
  0x11   :  { %23 = dma.hbm_to_vmem [thread:$0]  %s858_s1, 512, %s18_s13, [#allocation3], %s763_s22, %s763_s22, %s764_s23  }
  0x12   :  { %s765_s26 = smov [#allocation4]   ;;  %s736_s30 = scalar_lea.hbm %s859_s2, 3072 }
  0x13   :  { %s29_s27 = sshll.u32 %s765_s26, 4  ;;  %p737_p8 = scmp.ne.s32.totalorder %s859_s2, %s736_s30  ;;  %s30_s27 = int_to_ptr.vmem [resolvable:$true] %s29_s27 }
  0x14   :  { %p740_p9 = scmp.lt.u32.totalorder %s736_s30, %s859_s2 }
  0x16   :  { %p742_p10 = pnand %p740_p9, %p737_p8 }
  0x18   :  { %745 = shalt.err (!%p742_p10)
}
  0x19   :  { %s746_s8 = scalar_lea.vmem %s30_s27, 3072  ;;  %p751_p12 = scmp.lt.s32.totalorder %s30_s27, %s30_s27 }
  0x1a   :  { %p747_p11 = scmp.ne.s32.totalorder %s30_s27, %s746_s8  ;;  %p752_p13 = scmp.lt.s32.totalorder %s746_s8, %s746_s8 }
  0x1c   :  { %p753_p0 = por %p752_p13, %p751_p12 }
  0x1e   :  { %p754_p1 = pnand %p753_p0, %p747_p11 }
  0x20   :  { %757 = shalt.err (!%p754_p1)
}
  0x21   :  { %s766_s1 = smov 64   ;;  %s767_s9 = smov 4  }
  0x22   :  { %35 = dma.hbm_to_vmem [thread:$0]  %s859_s2, 3072, %s30_s27, [#allocation5], %s766_s1, %s766_s1, %s767_s9  }
  0x23   :  { %758 = dma.done.wait [#allocation3], 512  }
  0x24   :  { %759 = vsyncadd [#allocation3], 4294966784 }
  0x25   :  { %760 = dma.done.wait [#allocation5], 3072  }
  0x26   :  { %761 = vsyncadd [#allocation5], 4294964224  ;;  %v768_v0 = vmov 1   ;;  %v769_v1 = vmov 0   ;;  %v43_v2 = vld [vmem:[%s857_s0] sm:$0xff]  ;;  %v44_v3 = vld [vmem:[%s857_s0 + $0x8] sm:$0xff]  ;;  %v57_v28 = vlaneseq }
  0x27   :  { %669 = vset.pattern.permute.xlu1 %v768_v0  ;;  %668 = vset.pattern.permute.xlu0 %v769_v1  ;;  %v690_v4 = vld [vmem:[#allocation4 + $0x40] sm:$0xff]   ;;  %v692_v6 = vld [vmem:[#allocation4 + $0x48] sm:$0xff]   ;;  %v694_v8 = vld [vmem:[#allocation4 + $0x50] sm:$0xff]   ;;  %v770_v10 = vmov 2   ;;  %v771_v14 = vmov 3   ;;  %v772_v23 = vmov 0.0  }
  0x28   :  { %74 = vperm.xlu1 %669, %v43_v2   ;;  %48 = vperm.xlu0 %668, %v43_v2   ;;  %v691_v5 = vld [vmem:[#allocation4] sm:$0xff]   ;;  %v693_v7 = vld [vmem:[#allocation4 + $0x8] sm:$0xff]   ;;  %v695_v9 = vld [vmem:[#allocation4 + $0x10] sm:$0xff]   ;;  %v58_v29 = vshrl.u32 %v57_v28, 7  ;;  %vm773_vm0 = vmmov 0  }
  0x29   :  { %601 = vmatprep.subr.bf16.mxu0 %v690_v4  ;;  %v696_v11 = vld [vmem:[#allocation4 + $0x58] sm:$0xff]   ;;  %v698_v13 = vld [vmem:[#allocation4 + $0x60] sm:$0xff]   ;;  %v700_v16 = vld [vmem:[#allocation4 + $0x68] sm:$0xff]   ;;  %632 = vmatprep.subr.bf16.mxu1 %v772_v23 }
  0x2a   :  { %602 = vmatpush3.bf16.msra.mxu0 %v691_v5  ;;  %v697_v12 = vld [vmem:[#allocation4 + $0x18] sm:$0xff]   ;;  %v699_v15 = vld [vmem:[#allocation4 + $0x20] sm:$0xff]   ;;  %v701_v17 = vld [vmem:[#allocation4 + $0x28] sm:$0xff]   ;;  %v59_v32 = vsub.s32 0, %v58_v29  ;;  %v63_v33 = vsub.s32 1, %v58_v29  ;;  %648 = vmatprep.mubr.msk.bf16.mxu1 %vm773_vm0, %v772_v23 }
  0x2b   :  { %603 = vmatprep.subr.bf16.mxu0 %v692_v6  ;;  %v702_v18 = vld [vmem:[#allocation4 + $0x70] sm:$0xff]   ;;  %v704_v20 = vld [vmem:[#allocation4 + $0x78] sm:$0xff]   ;;  %v706_v22 = vld [vmem:[#allocation4 + $0x80] sm:$0xff]  }
  0x2c   :  { %78 = vperm.xlu1 %669, %v44_v3   ;;  %53 = vperm.xlu0 %668, %v44_v3   ;;  %v703_v19 = vld [vmem:[#allocation4 + $0x30] sm:$0xff]   ;;  %v705_v21 = vld [vmem:[#allocation4 + $0x38] sm:$0xff]   ;;  %v707_v24 = vld [vmem:[#allocation4 + $0x88] sm:$0xff]  }
  0x2d   :  { %633 = vmatpush3.bf16.msra.mxu1 %v706_v22  ;;  %v708_v25 = vld [vmem:[#allocation4 + $0x90] sm:$0xff]   ;;  %v709_v26 = vld [vmem:[#allocation4 + $0x98] sm:$0xff]   ;;  %v710_v27 = vld [vmem:[#allocation4 + $0xa0] sm:$0xff]  }
  0x2e   :  { %604 = vmatpush3.bf16.msra.mxu0 %v693_v7  ;;  %634 = vmatprep.subr.bf16.mxu1 %v772_v23  ;;  %v72_v34 = vld [vmem:[#allocation2 + $0x1] ss:$8 sm:$0x3]  ;;  %v45_v35 = vld [vmem:[#allocation2] ss:$8 sm:$0x3] }
  0x2f   :  { %605 = vmatprep.subr.bf16.mxu0 %v694_v8  ;;  %v85_v38 = vrot.slane %v72_v34, %v59_v32  ;;  %v89_v39 = vrot.slane %v72_v34, %v63_v33  ;;  %v60_v40 = vrot.slane %v45_v35, %v59_v32  ;;  %v64_v41 = vrot.slane %v45_v35, %v63_v33  ;;  %v101_v42 = vld [vmem:[#allocation2 + $0x2] ss:$8 sm:$0x3]  ;;  %v126_v43 = vld [vmem:[#allocation2 + $0x3] ss:$8 sm:$0x3] }
  0x30   :  { %671 = vset.pattern.permute.xlu1 %v770_v10  ;;  %670 = vset.pattern.permute.xlu0 %v770_v10  ;;  %v114_v46 = vrot.slane %v101_v42, %v59_v32  ;;  %v118_v47 = vrot.slane %v101_v42, %v63_v33  ;;  %v139_v48 = vrot.slane %v126_v43, %v59_v32  ;;  %v159_v50 = vld [vmem:[#allocation2 + $0x4] ss:$8 sm:$0x3]  ;;  %v712_v35 = vld [vmem:[#allocation4 + $0xb0] sm:$0xff]  }
  0x31   :  { %107 = vperm.xlu1 %671, %v44_v3   ;;  %103 = vperm.xlu0 %670, %v43_v2   ;;  %v143_v49 = vrot.slane %v126_v43, %v63_v33  ;;  %v164_v59 = vrot.slane %v159_v50, %v59_v32  ;;  %v168_v60 = vrot.slane %v159_v50, %v63_v33  ;;  %v711_v34 = vld [vmem:[#allocation4 + $0xa8] sm:$0xff]  }
  0x32   :  { %606 = vmatpush3.bf16.msra.mxu0 %v695_v9  ;;  %635 = vmatpush3.bf16.msra.mxu1 %v707_v24 }
  0x33   :  { %607 = vmatprep.subr.bf16.mxu0 %v696_v11  ;;  %636 = vmatprep.subr.bf16.mxu1 %v772_v23 }
  0x35   :  { %672 = vset.pattern.permute.xlu1 %v771_v14  ;;  %673 = vset.pattern.permute.xlu0 %v771_v14 }
  0x36   :  { %128 = vperm.xlu1 %672, %v43_v2   ;;  %132 = vperm.xlu0 %673, %v44_v3  }
  0x37   :  { %608 = vmatpush3.bf16.msra.mxu0 %v697_v12  ;;  %637 = vmatpush3.bf16.msra.mxu1 %v708_v25 }
  0x38   :  { %609 = vmatprep.subr.bf16.mxu0 %v698_v13  ;;  %638 = vmatprep.subr.bf16.mxu1 %v772_v23 }
  0x3a   :  { %674 = vset.pattern.permute.xlu1 %v769_v1  ;;  %675 = vset.pattern.permute.xlu0 %v768_v0 }
  0x3b   :  { %610 = vmatpush3.bf16.msra.mxu0 %v699_v15  ;;  %639 = vmatpush3.bf16.msra.mxu1 %v709_v26 }
  0x3c   :  { %611 = vmatprep.subr.bf16.mxu0 %v700_v16  ;;  %640 = vmatprep.subr.bf16.mxu1 %v772_v23 }
  0x3f   :  { %612 = vmatpush3.bf16.msra.mxu0 %v701_v17  ;;  %641 = vmatpush3.bf16.msra.mxu1 %v710_v27 }
  0x40   :  { %613 = vmatprep.subr.bf16.mxu0 %v702_v18  ;;  %642 = vmatprep.subr.bf16.mxu1 %v772_v23 }
  0x43   :  { %614 = vmatpush3.bf16.msra.mxu0 %v703_v19  ;;  %643 = vmatpush3.bf16.msra.mxu1 %v711_v34 }
  0x44   :  { %615 = vmatprep.subr.bf16.mxu0 %v704_v20  ;;  %644 = vmatprep.subr.bf16.mxu1 %v772_v23 }
  0x47   :  { %616 = vmatpush3.bf16.msra.mxu0 %v705_v21  ;;  %645 = vmatpush3.bf16.msra.mxu1 %v712_v35 }
  0x48   :  { %646 = vmatprep.subr.bf16.mxu1 %v772_v23 }
  0xa7   :  { %v75_v30 = vpop.permute.xlu1 %74  ;;  %v49_v31 = vpop.permute.xlu0 %48 }
  0xa8   :  { %v92_v51 = vmul.f32 %v85_v38, %v75_v30  ;;  %v93_v52 = vmul.f32 %v89_v39, %v75_v30  ;;  %v67_v53 = vmul.f32 %v60_v40, %v49_v31  ;;  %v68_v54 = vmul.f32 %v64_v41, %v49_v31 }
  0xaa   :  { %v96_v9 = vadd.f32 %v92_v51, %v67_v53  ;;  %v97_v11 = vadd.f32 %v93_v52, %v68_v54 }
  0xab   :  { %v79_v36 = vpop.permute.xlu1 %78  ;;  %v54_v37 = vpop.permute.xlu0 %53 }
  0xac   :  { %v94_v55 = vmul.f32 %v85_v38, %v79_v36  ;;  %v95_v56 = vmul.f32 %v89_v39, %v79_v36  ;;  %v69_v57 = vmul.f32 %v60_v40, %v54_v37  ;;  %v70_v58 = vmul.f32 %v64_v41, %v54_v37  ;;  %v713_v36 = vld [vmem:[#allocation4 + $0xb8] sm:$0xff]   ;;  %v213_v38 = vld [vmem:[#allocation2 + $0x5] ss:$0 sm:$0xff] }
  0xad   :  { %647 = vmatpush3.bf16.msra.mxu1 %v713_v36 }
  0xae   :  { %v98_v12 = vadd.f32 %v94_v55, %v69_v57  ;;  %v99_v13 = vadd.f32 %v95_v56, %v70_v58  ;;  %v774_v56 = vmov 4   ;;  %v775_v58 = vmov 5  }
  0xb0   :  { %v108_v44 = vpop.permute.xlu1 %107  ;;  %v104_v45 = vpop.permute.xlu0 %103 }
  0xb1   :  { %v123_v61 = vmul.f32 %v114_v46, %v108_v44  ;;  %v124_v62 = vmul.f32 %v118_v47, %v108_v44  ;;  %v121_v63 = vmul.f32 %v114_v46, %v104_v45  ;;  %v122_v2 = vmul.f32 %v118_v47, %v104_v45 }
  0xb5   :  { %v129_v3 = vpop.permute.xlu1 %128  ;;  %v133_v4 = vpop.permute.xlu0 %132 }
  0xb6   :  { %v146_v5 = vmul.f32 %v139_v48, %v129_v3  ;;  %v147_v6 = vmul.f32 %v143_v49, %v129_v3  ;;  %v148_v7 = vmul.f32 %v139_v48, %v133_v4  ;;  %v149_v8 = vmul.f32 %v143_v49, %v133_v4  ;;  %v370_v49 = vld [vmem:[#allocation2 + $0x6] ss:$0 sm:$0xff]  ;;  %v475_v4 = vld [vmem:[#allocation2 + $0x11] ss:$0 sm:$0xff] }
  0xb8   :  { %v150_v15 = vadd.f32 %v146_v5, %v121_v63  ;;  %v151_v16 = vadd.f32 %v147_v6, %v122_v2  ;;  %v152_v17 = vadd.f32 %v148_v7, %v123_v61  ;;  %v153_v18 = vadd.f32 %v149_v8, %v124_v62  ;;  %v462_v6 = vld [vmem:[#allocation2 + $0x10] ss:$0 sm:$0xff]  ;;  %v486_v7 = vld [vmem:[#allocation2 + $0x12] ss:$0 sm:$0xff] }
  0xba   :  { %v154_v19 = vadd.f32 %v150_v15, %v96_v9  ;;  %v156_v20 = vadd.f32 %v152_v17, %v98_v12  ;;  %v155_v21 = vadd.f32 %v151_v16, %v97_v11  ;;  %v157_v22 = vadd.f32 %v153_v18, %v99_v13  ;;  %v508_v9 = vld [vmem:[#allocation2 + $0x14] ss:$0 sm:$0xff]  ;;  %v530_v11 = vld [vmem:[#allocation2 + $0x16] ss:$0 sm:$0xff]  ;;  %v541_v12 = vld [vmem:[#allocation2 + $0x17] ss:$0 sm:$0xff] }
  0xbc   :  { %v172_v24 = vadd.f32 %v168_v60, %v155_v21  ;;  %v174_v25 = vadd.f32 %v168_v60, %v157_v22  ;;  %v171_v26 = vadd.f32 %v164_v59, %v154_v19  ;;  %v173_v27 = vadd.f32 %v164_v59, %v156_v20 }
  0xbd   :  { %v776_v59 = vmov 6   ;;  %v777_v60 = vmov 7  }
  0xbe   :  { %v176_v28 = vmax.f32 %v172_v24, 0.0  ;;  %v178_v29 = vmax.f32 %v174_v25, 0.0  ;;  %v175_v30 = vmax.f32 %v171_v26, 0.0  ;;  %v177_v31 = vmax.f32 %v173_v27, 0.0 }
  0xc0   :  { %v180_v32 = vpack.c.bf16 %v178_v29, %v176_v28  ;;  %v179_v33 = vpack.c.bf16 %v177_v31, %v175_v30  ;;  %v566_v31 = vld [vmem:[#allocation2 + $0x7] ss:$0 sm:$0xff] }
  0xc2   :  { %342 = vmatprep.mubr.bf16.mxu0 %v180_v32 }
  0xc3   :  { %343 = vmatmul.mubr.bf16.vlgmr.msra.gmra.mrb[0].mxu0 %v179_v33 }
 0x196   :  { %v617_v37 = vpop.f32.mrb[0].mxu0 }
 0x197   :  { %v618_v39 = vpop.f32.mrb[1].mxu0 }
 0x198   :  { %v619_v40 = vadd.f32 %v618_v39, %v617_v37  ;;  %v620_v41 = vpop.f32.mrb[2].mxu0 }
 0x199   :  { %v621_v42 = vpop.f32.mrb[3].mxu0 }
 0x19a   :  { %v345_v43 = vadd.f32 %v619_v40, %v213_v38  ;;  %v622_v44 = vadd.f32 %v621_v42, %v620_v41 }
 0x19c   :  { %v348_v45 = vadd.f32 %v622_v44, %v213_v38  ;;  %v351_v46 = vmax.f32 %v345_v43, 0.0 }
 0x19e   :  { %v352_v47 = vmax.f32 %v348_v45, 0.0 }
 0x1a0   :  { %v353_v48 = vpack.c.bf16 %v352_v47, %v351_v46 }
 0x1a2   :  { %649 = vmatmul.mubr.bf16.vlgmr.msra.gmra.mrb[0].mxu1 %v353_v48 }
 0x275   :  { %v453_v50 = vpop.f32.mrb[0].mxu1 }
 0x276   :  { %v454_v51 = vadd.f32 %v453_v50, %v370_v49  ;;  %v650_v52 = vpop.f32.mrb[1].mxu1 }
 0x277   :  { %v456_v53 = vpop.f32.mrb[2].mxu1 }
 0x278   :  { %v460_v54 = vmax.f32 %v454_v51, 0.0  ;;  %v651_v23 = vpop.f32.mrb[3].mxu1  ;;  %v457_v55 = vadd.f32 %v456_v53, %v370_v49 }
 0x27a   :  { %477 = vperm.xlu0 %675, %v460_v54   ;;  %465 = vperm.xlu1 %674, %v460_v54   ;;  %v461_v57 = vmax.f32 %v457_v55, 0.0 }
 0x27e   :  { %678 = vset.pattern.permute.xlu0 %v774_v56  ;;  %676 = vset.pattern.permute.xlu1 %v770_v10 }
 0x27f   :  { %510 = vperm.xlu0 %678, %v460_v54   ;;  %488 = vperm.xlu1 %676, %v460_v54  }
 0x283   :  { %683 = vset.pattern.permute.xlu0 %v770_v10  ;;  %677 = vset.pattern.permute.xlu1 %v771_v14 }
 0x284   :  { %499 = vperm.xlu1 %677, %v460_v54   ;;  %492 = vperm.xlu0 %683, %v461_v57  }
 0x288   :  { %679 = vset.pattern.permute.xlu1 %v775_v58  ;;  %686 = vset.pattern.permute.xlu0 %v775_v58 }
 0x289   :  { %521 = vperm.xlu1 %679, %v460_v54   ;;  %525 = vperm.xlu0 %686, %v461_v57  }
 0x28d   :  { %680 = vset.pattern.permute.xlu1 %v776_v59  ;;  %688 = vset.pattern.permute.xlu0 %v777_v60 }
 0x28e   :  { %532 = vperm.xlu1 %680, %v460_v54   ;;  %543 = vperm.xlu0 %688, %v460_v54  }
 0x292   :  { %681 = vset.pattern.permute.xlu1 %v769_v1  ;;  %v497_v1 = vld [vmem:[#allocation2 + $0x13] ss:$0 sm:$0xff] }
 0x293   :  { %470 = vperm.xlu1 %681, %v461_v57  }
 0x297   :  { %682 = vset.pattern.permute.xlu1 %v768_v0 }
 0x298   :  { %481 = vperm.xlu1 %682, %v461_v57  }
 0x29c   :  { %684 = vset.pattern.permute.xlu1 %v771_v14  ;;  %v519_v14 = vld [vmem:[#allocation2 + $0x15] ss:$0 sm:$0xff] }
 0x29d   :  { %503 = vperm.xlu1 %684, %v461_v57  }
 0x2a1   :  { %685 = vset.pattern.permute.xlu1 %v774_v56 }
 0x2a2   :  { %514 = vperm.xlu1 %685, %v461_v57  }
 0x2a6   :  { %687 = vset.pattern.permute.xlu1 %v776_v59 }
 0x2a7   :  { %536 = vperm.xlu1 %687, %v461_v57  }
 0x2ab   :  { %689 = vset.pattern.permute.xlu1 %v777_v60 }
 0x2ac   :  { %547 = vperm.xlu1 %689, %v461_v57  }
 0x2f9   :  { %v478_v10 = vpop.permute.xlu0 %477  ;;  %v466_v61 = vpop.permute.xlu1 %465 }
 0x2fa   :  { %v484_v13 = vmul.f32 %v478_v10, %v475_v4  ;;  %v473_v15 = vmul.f32 %v466_v61, %v462_v6 }
 0x2fc   :  { %v552_v25 = vadd.f32 %v484_v13, %v473_v15 }
 0x2fe   :  { %v511_v62 = vpop.permute.xlu0 %510  ;;  %v489_v63 = vpop.permute.xlu1 %488 }
 0x2ff   :  { %v495_v16 = vmul.f32 %v489_v63, %v486_v7  ;;  %v517_v20 = vmul.f32 %v511_v62, %v508_v9 }
 0x303   :  { %v500_v2 = vpop.permute.xlu1 %499  ;;  %v493_v3 = vpop.permute.xlu0 %492 }
 0x304   :  { %v506_v8 = vmul.f32 %v500_v2, %v497_v1  ;;  %v496_v39 = vmul.f32 %v493_v3, %v486_v7 }
 0x306   :  { %v554_v21 = vadd.f32 %v506_v8, %v495_v16 }
 0x308   :  { %v522_v5 = vpop.permute.xlu1 %521  ;;  %v526_v0 = vpop.permute.xlu0 %525  ;;  %v556_v28 = vadd.f32 %v554_v21, %v552_v25 }
 0x309   :  { %v528_v17 = vmul.f32 %v522_v5, %v519_v14  ;;  %v529_v42 = vmul.f32 %v526_v0, %v519_v14 }
 0x30b   :  { %v558_v26 = vadd.f32 %v528_v17, %v517_v20 }
 0x30d   :  { %v533_v18 = vpop.permute.xlu1 %532  ;;  %v544_v19 = vpop.permute.xlu0 %543 }
 0x30e   :  { %v539_v22 = vmul.f32 %v533_v18, %v530_v11  ;;  %v550_v24 = vmul.f32 %v544_v19, %v541_v12 }
 0x310   :  { %v560_v27 = vadd.f32 %v550_v24, %v539_v22 }
 0x312   :  { %v562_v29 = vadd.f32 %v560_v27, %v558_v26  ;;  %v471_v30 = vpop.permute.xlu1 %470 }
 0x313   :  { %v474_v44 = vmul.f32 %v471_v30, %v462_v6 }
 0x314   :  { %v564_v32 = vadd.f32 %v562_v29, %v556_v28 }
 0x316   :  { %v567_v33 = vadd.f32 %v566_v31, %v564_v32 }
 0x317   :  { %v482_v34 = vpop.permute.xlu1 %481 }
 0x318   :  { %569 = vst [vmem:[%s860_s3] sm:$0xff] %v567_v33  ;;  %v485_v40 = vmul.f32 %v482_v34, %v475_v4 }
 0x31a   :  { %v553_v48 = vadd.f32 %v485_v40, %v474_v44 }
 0x31c   :  { %v504_v35 = vpop.permute.xlu1 %503 }
 0x31d   :  { %v507_v38 = vmul.f32 %v504_v35, %v497_v1 }
 0x31f   :  { %v555_v45 = vadd.f32 %v507_v38, %v496_v39 }
 0x321   :  { %v515_v36 = vpop.permute.xlu1 %514  ;;  %v557_v51 = vadd.f32 %v555_v45, %v553_v48 }
 0x322   :  { %v518_v41 = vmul.f32 %v515_v36, %v508_v9 }
 0x324   :  { %v559_v49 = vadd.f32 %v529_v42, %v518_v41 }
 0x326   :  { %v537_v37 = vpop.permute.xlu1 %536 }
 0x327   :  { %v540_v46 = vmul.f32 %v537_v37, %v530_v11 }
 0x32b   :  { %v548_v43 = vpop.permute.xlu1 %547 }
 0x32c   :  { %v551_v47 = vmul.f32 %v548_v43, %v541_v12 }
 0x32e   :  { %v561_v50 = vadd.f32 %v551_v47, %v540_v46 }
 0x330   :  { %v563_v52 = vadd.f32 %v561_v50, %v559_v49 }
 0x332   :  { %v565_v53 = vadd.f32 %v563_v52, %v557_v51 }
 0x334   :  { %v568_v54 = vadd.f32 %v566_v31, %v565_v53 }
 0x336   :  { %570 = vst [vmem:[%s860_s3 + $0x8] sm:$0xff] %v568_v54 }
 0x337   :  { %575 = vsyncpa [#allocation3], 1 }
 0x338   :  { %576 = vsyncpa [#allocation5], 1 }

</bundles_post_ra>
